<compile_context>
chip_gen: v7x
topology: tpu7x:2x2x1
jax: 0.10.0
libtpu: 0.0.40
codegen_flags: <defaults>
</compile_context>

<pallas_src>
import jax
import jax.numpy as jnp
from jax.experimental import pallas as pl
from jax.experimental.pallas import tpu as pltpu


def _round_up(x, m):
    return (x + m - 1) // m * m


def _ordinal_kernel(a_ref, b_ref, ord_ref, dec_ref):
    # a_ref, b_ref: (1, ord_num, TW) tiles of the even / odd channels.
    a = jnp.clip(a_ref[...].astype(jnp.float32), 1e-8, 1e8)
    b = jnp.clip(b_ref[...].astype(jnp.float32), 1e-8, 1e8)
    # p = exp(b) / (exp(a) + exp(b)) = 1 / (1 + exp(a - b)): single exp.
    p = 1.0 / (1.0 + jnp.exp(a - b))
    ord_ref[...] = p.astype(ord_ref.dtype)
    # decode label = count of ordinal probs > 0.5 along ord_num (sublane) axis.
    dec_ref[...] = jnp.sum((p > 0.5).astype(jnp.int32), axis=1, keepdims=True)


def ordinal_regression_layer(x, *, lane_tile=2048):
    """x: (N, C, H, W) float array (NCHW, same as PyTorch).

    Returns (decode_c, ord_c1):
      decode_c: (N, 1, H, W) int32
      ord_c1:   (N, ord_num, H, W) float32
    """
    N, C, H, W = x.shape
    assert C % 2 == 0, "channel dim must be even (2K ordinal bins)"
    ord_num = C // 2
    HW = H * W

    # Lane tile: multiple of 128, capped by the (rounded-up) spatial extent.
    TW = min(lane_tile, _round_up(HW, 128))
    HW_pad = _round_up(HW, TW)
    num_t = HW_pad // TW

    # Free contiguous reshape: (N, C, H, W) -> (N, ord_num, 2, HW).
    x4 = x.reshape(N, ord_num, 2, HW)
    if HW_pad != HW:
        # Pad only when needed so all stores stay unmasked / lane-dense.
        x4 = jnp.pad(x4, ((0, 0), (0, 0), (0, 0), (0, HW_pad - HW)))
    # (N, ord_num, 2*HW_pad): per ord row, lanes [0, HW_pad) hold the even
    # channel (A), lanes [HW_pad, 2*HW_pad) hold the odd channel (B).
    x3 = x4.reshape(N, ord_num, 2 * HW_pad)

    ord_flat, dec_flat = pl.pallas_call(
        _ordinal_kernel,
        out_shape=(
            jax.ShapeDtypeStruct((N, ord_num, HW_pad), jnp.float32),
            jax.ShapeDtypeStruct((N, 1, HW_pad), jnp.int32),
        ),
        grid_spec=pltpu.PrefetchScalarGridSpec(
            num_scalar_prefetch=0,
            grid=(N, num_t),
            in_specs=[
                # Even channels (A): lane blocks [t*TW, (t+1)*TW).
                pl.BlockSpec((1, ord_num, TW), lambda n, t: (n, 0, t)),
                # Odd channels (B): same array, lane blocks offset by HW_pad.
                pl.BlockSpec((1, ord_num, TW), lambda n, t: (n, 0, t + num_t)),
            ],
            out_specs=[
                pl.BlockSpec((1, ord_num, TW), lambda n, t: (n, 0, t)),
                pl.BlockSpec((1, 1, TW), lambda n, t: (n, 0, t)),
            ],
        ),
        compiler_params=pltpu.CompilerParams(
            dimension_semantics=("parallel", "parallel"),
        ),
    )(x3, x3)

    if HW_pad != HW:
        ord_flat = ord_flat[:, :, :HW]
        dec_flat = dec_flat[:, :, :HW]
    ord_c1 = ord_flat.reshape(N, ord_num, H, W)
    decode_c = dec_flat.reshape(N, 1, H, W)
    return decode_c, ord_c1


def _reference(x):
    # Pure-JAX reference mirroring the PyTorch code exactly.
    N, C, H, W = x.shape
    ord_num = C // 2
    A = x[:, 0::2, :, :].reshape(N, 1, ord_num * H * W)
    B = x[:, 1::2, :, :].reshape(N, 1, ord_num * H * W)
    Cc = jnp.clip(jnp.concatenate((A, B), axis=1), 1e-8, 1e8)
    ord_c = jax.nn.softmax(Cc, axis=1)
    ord_c1 = ord_c[:, 1, :].reshape(-1, ord_num, H, W)
    decode_c = jnp.sum((ord_c1 > 0.5).astype(jnp.int32), axis=1).reshape(-1, 1, H, W)
    return decode_c, ord_c1


if __name__ == "__main__":
    key = jax.random.PRNGKey(0)
    N, C, H, W = 2, 4, 16, 16  # C = 2K -> ord_num = 2
    x = jax.random.normal(key, (N, C, H, W), dtype=jnp.float32)

    decode_c, ord_c1 = ordinal_regression_layer(x)
    jax.block_until_ready((decode_c, ord_c1))

    # Correctness check against the pure-JAX reference.
    ref_dec, ref_ord = _reference(x)
    assert ord_c1.shape == (N, C // 2, H, W)
    assert decode_c.shape == (N, 1, H, W)
    assert jnp.allclose(ord_c1, ref_ord, atol=1e-6, rtol=1e-6)
    assert jnp.array_equal(decode_c, ref_dec)

    print("KERNEL_OK")
</pallas_src>

<mosaic_0001>
module attributes {stable_mosaic.version = 11 : i64} {
  func.func @_ordinal_kernel(%arg0: i32, %arg1: i32, %arg2: memref<1x2x256xf32, #tpu.memory_space<vmem>>, %arg3: memref<1x2x256xf32, #tpu.memory_space<vmem>>, %arg4: memref<1x2x256xf32, #tpu.memory_space<vmem>>, %arg5: memref<1x1x256xi32, #tpu.memory_space<vmem>>) attributes {dimension_semantics = [#tpu.dimension_semantics<parallel>, #tpu.dimension_semantics<parallel>], iteration_bounds = array<i64: 2, 1>, scalar_prefetch = 0 : i64, scratch_operands = 0 : i64, tpu.core_type = #tpu.core_type<tc>, window_params = [{transform_indices = @transform_0, window_bounds = array<i64: 1, 2, 256>}, {transform_indices = @transform_1, window_bounds = array<i64: 1, 2, 256>}, {transform_indices = @transform_2, window_bounds = array<i64: 1, 2, 256>}, {transform_indices = @transform_3, window_bounds = array<i64: 1, 1, 256>}]} {
    %c0 = arith.constant 0 : index
    %c0_0 = arith.constant 0 : index
    %c0_1 = arith.constant 0 : index
    %0 = vector.load %arg2[%c0, %c0_0, %c0_1] : memref<1x2x256xf32, #tpu.memory_space<vmem>>, vector<1x2x256xf32>
    %cst = arith.constant 9.99999993E-9 : f32
    %cst_2 = arith.constant 1.000000e+08 : f32
    %1 = vector.broadcast %cst : f32 to vector<1x2x256xf32>
    %2 = arith.maximumf %1, %0 : vector<1x2x256xf32>
    %3 = vector.broadcast %cst_2 : f32 to vector<1x2x256xf32>
    %4 = arith.minimumf %3, %2 : vector<1x2x256xf32>
    %c0_3 = arith.constant 0 : index
    %c0_4 = arith.constant 0 : index
    %c0_5 = arith.constant 0 : index
    %5 = vector.load %arg3[%c0_3, %c0_4, %c0_5] : memref<1x2x256xf32, #tpu.memory_space<vmem>>, vector<1x2x256xf32>
    %cst_6 = arith.constant 9.99999993E-9 : f32
    %cst_7 = arith.constant 1.000000e+08 : f32
    %6 = vector.broadcast %cst_6 : f32 to vector<1x2x256xf32>
    %7 = arith.maximumf %6, %5 : vector<1x2x256xf32>
    %8 = vector.broadcast %cst_7 : f32 to vector<1x2x256xf32>
    %9 = arith.minimumf %8, %7 : vector<1x2x256xf32>
    %10 = arith.subf %4, %9 : vector<1x2x256xf32>
    %11 = math.exp %10 : vector<1x2x256xf32>
    %cst_8 = arith.constant 1.000000e+00 : f32
    %12 = vector.broadcast %cst_8 : f32 to vector<1x2x256xf32>
    %13 = arith.addf %12, %11 : vector<1x2x256xf32>
    %cst_9 = arith.constant 1.000000e+00 : f32
    %14 = vector.broadcast %cst_9 : f32 to vector<1x2x256xf32>
    %15 = arith.divf %14, %13 : vector<1x2x256xf32>
    %c0_10 = arith.constant 0 : index
    %c0_11 = arith.constant 0 : index
    %c0_12 = arith.constant 0 : index
    %16 = vector.load %arg4[%c0_10, %c0_11, %c0_12] : memref<1x2x256xf32, #tpu.memory_space<vmem>>, vector<1x2x256xf32>
    tpu.vector_store %arg4[%c0_10, %c0_11, %c0_12], %15 {strides = array<i32>} : memref<1x2x256xf32, #tpu.memory_space<vmem>>, vector<1x2x256xf32>,
    %cst_13 = arith.constant 5.000000e-01 : f32
    %17 = vector.broadcast %cst_13 : f32 to vector<1x2x256xf32>
    %18 = arith.cmpf ogt, %15, %17 : vector<1x2x256xf32>
    %19 = arith.extui %18 : vector<1x2x256xi1> to vector<1x2x256xi32>
    %cst_14 = arith.constant dense<0> : vector<1x256xi32>
    %20 = vector.multi_reduction <add>, %19, %cst_14 [1] : vector<1x2x256xi32> to vector<1x256xi32>
    %21 = vector.shape_cast %20 : vector<1x256xi32> to vector<1x1x256xi32>
    %c0_15 = arith.constant 0 : index
    %c0_16 = arith.constant 0 : index
    %c0_17 = arith.constant 0 : index
    %22 = vector.load %arg5[%c0_15, %c0_16, %c0_17] : memref<1x1x256xi32, #tpu.memory_space<vmem>>, vector<1x1x256xi32>
    tpu.vector_store %arg5[%c0_15, %c0_16, %c0_17], %21 {strides = array<i32>} : memref<1x1x256xi32, #tpu.memory_space<vmem>>, vector<1x1x256xi32>,
    return
  }
  func.func @transform_0(%arg0: i32, %arg1: i32) -> (i32, i32, i32) {
    %c0_i32 = arith.constant 0 : i32
    %c0_i32_0 = arith.constant 0 : i32
    return %arg0, %c0_i32, %arg1 : i32, i32, i32
  }
  func.func @transform_1(%arg0: i32, %arg1: i32) -> (i32, i32, i32) {
    %c1_i32 = arith.constant 1 : i32
    %0 = arith.addi %arg1, %c1_i32 : i32
    %c0_i32 = arith.constant 0 : i32
    %c0_i32_0 = arith.constant 0 : i32
    return %arg0, %c0_i32, %0 : i32, i32, i32
  }
  func.func @transform_2(%arg0: i32, %arg1: i32) -> (i32, i32, i32) {
    %c0_i32 = arith.constant 0 : i32
    %c0_i32_0 = arith.constant 0 : i32
    return %arg0, %c0_i32, %arg1 : i32, i32, i32
  }
  func.func @transform_3(%arg0: i32, %arg1: i32) -> (i32, i32, i32) {
    %c0_i32 = arith.constant 0 : i32
    %c0_i32_0 = arith.constant 0 : i32
    return %arg0, %c0_i32, %arg1 : i32, i32, i32
  }
}

</mosaic_0001>

<bundles_post_ra>
// kernel: tpu_custom_call.1
= control target key start
LH: loop header
LB: loop body
LE: loop exit
PB: predicated region body
PF: predicated region fallthrough
CT: control target
= control target key end

     0   :  { %9 = vsyncpa [#allocation3], 0  ;;  %s1083_s0 = inlined_call_operand.hbm [shape: f32[2,2,512], index: 0, kind: input, shape index: {}]   ;;  %s1084_s1 = inlined_call_operand.hbm [shape: f32[2,2,512], index: 1, kind: input, shape index: {}]   ;;  %s1085_s2 = inlined_call_operand.hbm [shape: f32[2,2,256], index: 2, kind: output, shape index: {0}]   ;;  %s1086_s3 = inlined_call_operand.hbm [shape: s32[2,1,256], index: 3, kind: output, shape index: {1}]  }
   0x1   :  { %11 = vsyncpa [#allocation3 + $0x1], 0 }
   0x2   :  { %12 = vsyncpa [#allocation6], 0 }
   0x3   :  { %14 = vsyncpa [#allocation6 + $0x1], 0 }
   0x4   :  { %15 = vsyncpa [#allocation4], 0 }
   0x5   :  { %17 = vsyncpa [#allocation4 + $0x1], 0 }
   0x6   :  { %18 = vsyncpa [#allocation9], 0 }
   0x7   :  { %20 = vsyncpa [#allocation9 + $0x1], 0  ;;  %s824_s12 = smov 0   ;;  %s826_s13 = smov 0  }
   0x8   :  { %s828_s14 = smov 0   ;;  %s830_s15 = smov 0  }
   0x9   :  { %s832_s16 = smov 0   ;;  %s834_s17 = smov 0  }
   0xa LB: > { %s510_s18 = sadd.s32 4294967295, %s795_s17   ;;  %s511_s19 = sadd.s32 4294967294, %s795_s17   ;;  %s795_s17 = sphi %s834_s17, %s26_s17   ;;  %s791_s16 = sphi %s832_s16, %s1106_s16   ;;  %s787_s15 = sphi %s830_s15, %s1105_s15   ;;  %s783_s14 = sphi %s828_s14, %s1104_s14   ;;  %s779_s13 = sphi %s826_s13, %s1103_s13   ;;  %s775_s12 = sphi %s824_s12, %s1102_s12  }
   0xb   : > { %s38_s20 = sadd.s32 1, %s791_s16  ;;  %s47_s21 = sadd.s32 1, %s783_s14 }
   0xc   : > { %p40_p0 = scmp.ge.s32.totalorder %s38_s20, 2  ;;  %p54_p1 = scmp.ne.s32.totalorder %s783_s14, %s779_s13 }
   0xd   : > { %p55_p2 = scmp.eq.s32.totalorder %s795_s17, 0  ;;  %p60_p3 = scmp.ne.s32.totalorder %s779_s13, %s775_s12 }
   0xe   : > { %s1108_s20 = smov (%p40_p0, %s38_s20), 0  ;;  %p61_p5 = scmp.eq.s32.totalorder %s510_s18, 0 }
   0xf   : > { %p865_p4 = por %p55_p2, %p54_p1  ;;  %s42_s23 = ssub.s32 %s791_s16, %s1108_s20 }
  0x10   : > { %p116_p6 = scmp.eq.s32.totalorder %s510_s18, 1  ;;  %p45_p7 = scmp.eq.s32.totalorder %s42_s23, 0 }
  0x11   : > { %p871_p8 = por %p61_p5, %p60_p3  ;;  %p122_p10 = scmp.eq.s32.totalorder %s511_s19, 1 }
  0x12   : > { %p875_p9 = por %p116_p6, %p54_p1  ;;  %p559_p13 = scmp.lt.s32.totalorder %s795_s17, 2 }
  0x13   : > { %s1090_s24 = scalar_select %p871_p8, 1, 0 }
  0x14   : > { %s1091_s25 = scalar_select %p875_p9, 1, 0 }
  0x15   : > { %s880_s26 = scalar_select %p45_p7, %s783_s14, %s47_s21  }
  0x16   : > { %p882_p11 = por %p122_p10, %p60_p3  ;;  %s889_s28 = sand.u32 1, %s783_s14  }
  0x17   : > { %s514_s29 = sshll.u32 %s889_s28, 2  ;;  %s533_s30 = sshll.u32 %s791_s16, 7 }
  0x18   : > { %s1092_s27 = scalar_select %p882_p11, 1, 0 }
  0x19   : > { %s898_s6 = scalar_lea.hbm %s1083_s0, %s533_s30  ;;  %s174_s7 = scalar_lea.vmem [#allocation2], %s514_s29 }
  0x1a   : > { %s184_s8 = sshll.u32 %s174_s7, 4  ;;  %p906_p0 = pnand %p559_p13, %p865_p4  ;;  %s902_s8 = int_to_ptr.vmem [resolvable:$true] %s184_s8 }
  0x1b   : > { %s171_s10 = scalar_lea.sflag [#allocation3], %s889_s28  ;;  %s616_s11 = scalar_lea.hbm %s898_s6, 64 }
  0x1c   : > { %p617_p3 = scmp.ne.s32.totalorder %s898_s6, %s616_s11  ;;  %p618_p5 = pneg %p906_p0 }
  0x1d   : > { %s621_s21 = scalar_lea.hbm %s1083_s0, 256  ;;  %p622_p4 = scmp.lt.u32.totalorder %s898_s6, %s1083_s0 }
  0x1e   : > { %p619_p6 = pnand %p618_p5, %p617_p3  ;;  %p623_p10 = scmp.lt.u32.totalorder %s621_s21, %s616_s11 }
  0x1f   : > { %p625_p12 = scmp.lt.u32.totalorder %s616_s11, %s898_s6 }
  0x20   : > { %p620_p7 = pneg %p619_p6  ;;  %p624_p13 = por %p623_p10, %p622_p4 }
  0x22   : > { %p626_p1 = por %p625_p12, %p624_p13 }
  0x24   : > { %p627_p2 = pnand %p626_p1, %p620_p7 }
  0x26   : > { %630 = shalt.err (!%p627_p2)
}
  0x27   : > { %s631_s4 = scalar_lea.vmem %s902_s8, 64  ;;  %s797_s5 = smov [#allocation2]  }
  0x28   : > { %p632_p3 = scmp.ne.s32.totalorder %s902_s8, %s631_s4  ;;  %s636_s7 = sshll.u32 %s797_s5, 4  ;;  %s637_s7 = int_to_ptr.vmem [resolvable:$false] %s636_s7 }
  0x29   : > { %s638_s18 = scalar_lea.vmem %s637_s7, 128  ;;  %p639_p9 = scmp.lt.s32.totalorder %s902_s8, %s637_s7 }
  0x2a   : > { %p634_p6 = pnand %p632_p3, %p618_p5  ;;  %p640_p4 = scmp.lt.s32.totalorder %s638_s18, %s631_s4 }
  0x2c   : > { %p635_p11 = pneg %p634_p6  ;;  %p641_p10 = por %p640_p4, %p639_p9 }
  0x2e   : > { %p642_p12 = pnand %p641_p10, %p635_p11 }
  0x30   : > { %645 = shalt.err (!%p642_p12)
}
  0x31   : > { %548 = dma.hbm_to_vmem [thread:$0]  (!%p906_p0), %s898_s6, 64, %s902_s8, %s171_s10  }
  0x32   : > { %p1094_p1 = scmp.lt.s32.totalorder %s795_s17, 3  ;;  %p1095_p2 = scmp.ge.s32.totalorder %s795_s17, 1 }
  0x33   : > { %s418_s22 = scalar_lea.hbm %s1084_s1, %s533_s30  ;;  %s195_s23 = scalar_lea.vmem [#allocation5], %s514_s29 }
  0x34   : > { %p942_p7 = pnand %p1095_p2, %p1094_p1  ;;  %s206_s4 = sshll.u32 %s195_s23, 4  ;;  %s207_s4 = int_to_ptr.vmem [resolvable:$true] %s206_s4 }
  0x35   : > { %s953_s5 = scalar_lea.hbm %s418_s22, 64  ;;  %s192_s6 = scalar_lea.sflag [#allocation6], %s889_s28 }
  0x36   : > { %s1096_s11 = scalar_select %p942_p7, 1, 0 }
  0x37   : > { %s676_s8 = scalar_lea.hbm %s418_s22, 128  ;;  %s651_s30 = scalar_lea.hbm %s1084_s1, 256 }
  0x38   : > { %p647_p9 = scmp.ne.s32.totalorder %s953_s5, %s676_s8  ;;  %p652_p3 = scmp.lt.u32.totalorder %s953_s5, %s1084_s1 }
  0x39   : > { %p653_p6 = scmp.lt.u32.totalorder %s651_s30, %s676_s8  ;;  %p655_p10 = scmp.lt.u32.totalorder %s676_s8, %s953_s5 }
  0x3a   : > { %p649_p11 = pnand %p647_p9, %p618_p5 }
  0x3b   : > { %p654_p4 = por %p653_p6, %p652_p3 }
  0x3c   : > { %p650_p13 = pneg %p649_p11 }
  0x3d   : > { %p656_p12 = por %p655_p10, %p654_p4 }
  0x3f   : > { %p657_p1 = pnand %p656_p12, %p650_p13 }
  0x41   : > { %660 = shalt.err (!%p657_p1)
}
  0x42   : > { %s661_s28 = scalar_lea.vmem %s207_s4, 64  ;;  %s798_s19 = smov [#allocation5]  }
  0x43   : > { %p662_p2 = scmp.ne.s32.totalorder %s207_s4, %s661_s28  ;;  %s666_s21 = sshll.u32 %s798_s19, 4  ;;  %s667_s21 = int_to_ptr.vmem [resolvable:$false] %s666_s21 }
  0x44   : > { %s668_s22 = scalar_lea.vmem %s667_s21, 128  ;;  %p669_p8 = scmp.lt.s32.totalorder %s207_s4, %s667_s21 }
  0x45   : > { %p664_p9 = pnand %p662_p2, %p618_p5  ;;  %p670_p7 = scmp.lt.s32.totalorder %s668_s22, %s661_s28 }
  0x47   : > { %p665_p11 = pneg %p664_p9  ;;  %p671_p3 = por %p670_p7, %p669_p8 }
  0x49   : > { %p672_p6 = pnand %p671_p3, %p665_p11 }
  0x4b   : > { %675 = shalt.err (!%p672_p6)
}
  0x4c   : > { %551 = dma.hbm_to_vmem [thread:$0]  (!%p906_p0), %s953_s5, 64, %s207_s4, %s192_s6  }
  0x4d   : > { %p1097_p13 = scmp.ne.s32.totalorder %s1096_s11, 0 }
  0x4e   : > { %s977_s23 = sand.u32 (!%p1097_p13), 1, %s779_s13   ;;  %p1098_p8 = scmp.ne.s32.totalorder (!%p1097_p13), %s1090_s24, 0 }
  0x4f   : > { %215 = sbr.rel (%p1097_p13) target bundleno = 173 (0xad), region = 28  ;;  %s980_s8 = sshll.u32 (!%p1097_p13), %s977_s23, 2 }
  0x50   : > { %s218_s10 = scalar_lea.sflag (!%p1097_p13), [#allocation3], %s977_s23  ;;  %s221_s7 = scalar_lea.vmem (!%p1097_p13), [#allocation2], %s980_s8 }
  0x56   : > { %758 = dma.done.wait (%p1098_p8), %s218_s10, 64  }
  0x57   : > { %760 = vsyncadd (%p1098_p8), %s218_s10, 4294967232  ;;  %s227_s9 = scalar_lea.sflag [#allocation6], %s977_s23  ;;  %s230_s11 = scalar_lea.vmem [#allocation5], %s980_s8 }
  0x58   : > { %762 = dma.done.wait (%p1098_p8), %s227_s9, 64  }
  0x59   : > { %764 = vsyncadd (%p1098_p8), %s227_s9, 4294967232  ;;  %v268_v0 = vld [vmem:[%s221_s7] sm:$0xf]  ;;  %v271_v1 = vld [vmem:[%s230_s11] sm:$0xf]  ;;  %v286_v12 = vlaneseq  ;;  %s255_s24 = scalar_lea.vmem [#allocation7], %s980_s8 }
  0x5a   : > { %v269_v2 = vmax.f32 %v268_v0, 1e-08  ;;  %v272_v3 = vmax.f32 %v271_v1, 1e-08  ;;  %v799_v10 = vmov 1983009808  }
  0x5b   : > { %v284_v11 = vunpack.c.l.s4 %v799_v10  ;;  %s348_s4 = sshll.u32 %s255_s24, 4  ;;  %v287_v14 = vshrl.u32 %v286_v12, 7  ;;  %s535_s5 = sshll.u32 %s787_s15, 6  ;;  %v800_v17 = vmov 0   ;;  %vm291_vm1 = vcmask 1041408   ;;  %s997_s4 = int_to_ptr.vmem [resolvable:$true] %s348_s4 }
  0x5c   : > { %v270_v4 = vmin.f32 %v269_v2, 1e+08  ;;  %v273_v5 = vmin.f32 %v272_v3, 1e+08  ;;  %s1002_s18 = scalar_lea.hbm %s1085_s2, %s535_s5  ;;  %s327_s29 = scalar_lea.sflag [#allocation4], %s977_s23 }
  0x5d   : > { %v285_v13 = vunpack.c.0.s8 %v284_v11  ;;  %s677_s28 = scalar_lea.vmem %s997_s4, 64  ;;  %p1099_p5 = scmp.ne.s32.totalorder %s1091_s25, 0 }
  0x5e   : > { %v274_v6 = vsub.f32 %v270_v4, %v273_v5  ;;  %p678_p0 = scmp.ne.s32.totalorder %s997_s4, %s677_s28  ;;  %s801_s19 = smov [#allocation7]  }
  0x5f   : > { %v288_v15 = vsub.s32 %v285_v13, %v287_v14  ;;  %s681_s21 = sshll.u32 %s801_s19, 4  ;;  %s682_s21 = int_to_ptr.vmem [resolvable:$false] %s681_s21 }
  0x60   : > { %v275_v7 = vmul.f32 1.442695, %v274_v6  ;;  %p679_p7 = pnand %p678_p0, %p1099_p5  ;;  %s683_s22 = scalar_lea.vmem %s682_s21, 128 }
  0x61   : > { %p684_p10 = scmp.lt.s32.totalorder %s997_s4, %s682_s21  ;;  %p685_p12 = scmp.lt.s32.totalorder %s683_s22, %s677_s28 }
  0x62   : > { %612 = vpow2.f32 %v275_v7  ;;  %p680_p4 = pneg %p679_p7 }
  0x63   : > { %p686_p1 = por %p685_p12, %p684_p10 }
  0x65   : > { %p687_p2 = pnand %p686_p1, %p680_p4 }
  0x6c   : > { %v613_v8 = vpop.eup %612 }
  0x6d   : > { %v277_v9 = vadd.f32 1.0, %v613_v8 }
  0x6f   : > { %614 = vrcp.f32 %v277_v9 }
  0x79   : > { %v615_v16 = vpop.eup %614 }
  0x7a   : > { %280 = vst [vmem:[%s255_s24] sm:$0xf] %v615_v16  ;;  %vm281_vm0 = vcmp.gt.f32.partialorder %v615_v16, 0.5 }
  0x7b   : > { %v282_v18 = vsel %vm281_vm0, 1, %v800_v17 }
  0x7c   : > { %690 = shalt.err (!%p687_p2)
}
  0x7d   : > { %s691_s8 = scalar_lea.hbm %s1002_s18, 64  ;;  %s695_s9 = scalar_lea.hbm %s1085_s2, 128 }
  0x7e   : > { %p692_p9 = scmp.ne.s32.totalorder %s1002_s18, %s691_s8  ;;  %p696_p6 = scmp.lt.u32.totalorder %s1002_s18, %s1085_s2 }
  0x7f   : > { %p697_p13 = scmp.lt.u32.totalorder %s695_s9, %s691_s8  ;;  %p699_p0 = scmp.lt.u32.totalorder %s691_s8, %s1002_s18 }
  0x80   : > { %p693_p11 = pnand %p692_p9, %p1099_p5 }
  0x81   : > { %p698_p8 = por %p697_p13, %p696_p6 }
  0x82   : > { %p694_p3 = pneg %p693_p11 }
  0x83   : > { %p700_p7 = por %p699_p0, %p698_p8 }
  0x85   : > { %p701_p4 = pnand %p700_p7, %p694_p3 }
  0x87   : > { %704 = shalt.err (!%p701_p4)
}
  0x88   : > { %541 = dma.vmem_to_hbm [thread:$0]  (%p1099_p5), %s997_s4, 64, %s1002_s18, %s327_s29   ;;  %v289_v19 = vrot.slane %v282_v18, %v288_v15  ;;  %v802_v28 = vmov 1966171168   ;;  %vm323_vm2 = vcmp.lt.s32.totalorder %v286_v12, 256 }
  0x89   : > { %v308_v29 = vunpack.c.l.s4 %v802_v28  ;;  %s524_s5 = sshll.u32 %s977_s23, 1  ;;  %s536_s30 = sshll.u32 %s787_s15, 5 }
  0x8a   : > { %v290_v20 = vcombine.high %v289_v19, %v289_v19  ;;  %v292_v21 = vsel %vm291_vm1, %v289_v19, 0  ;;  %s262_s4 = scalar_lea.vmem [#allocation8], %s524_s5  ;;  %s1036_s28 = scalar_lea.hbm %s1086_s3, %s536_s30 }
  0x8b   : > { %v293_v22 = vrot.slane %v292_v21, 4  ;;  %v309_v34 = vunpack.c.0.s8 %v308_v29  ;;  %s364_s6 = sshll.u32 %s262_s4, 4  ;;  %s332_s19 = scalar_lea.sflag [#allocation9], %s977_s23  ;;  %s1031_s6 = int_to_ptr.vmem [resolvable:$true] %s364_s6 }
  0x8c   : > { %v299_v23 = vsel %vm291_vm1, %v290_v20, 0  ;;  %s705_s21 = scalar_lea.vmem %s1031_s6, 32  ;;  %s803_s15 = smov [#allocation8]  }
  0x8d   : > { %v294_v24 = vadd.s32 %v293_v22, %v292_v21  ;;  %v300_v25 = vrot.slane %v299_v23, 4  ;;  %v312_v38 = vsub.s32 %v309_v34, %v287_v14  ;;  %p706_p10 = scmp.ne.s32.totalorder %s1031_s6, %s705_s21  ;;  %s709_s22 = sshll.u32 %s803_s15, 4  ;;  %s710_s22 = int_to_ptr.vmem [resolvable:$false] %s709_s22 }
  0x8e   : > { %s711_s8 = scalar_lea.vmem %s710_s22, 64  ;;  %p712_p2 = scmp.lt.s32.totalorder %s1031_s6, %s710_s22 }
  0x8f   : > { %v295_v26 = vrot.slane %v294_v24, 2  ;;  %v301_v27 = vadd.s32 %v300_v25, %v299_v23  ;;  %p707_p12 = pnand %p706_p10, %p1099_p5  ;;  %p713_p9 = scmp.lt.s32.totalorder %s711_s8, %s705_s21 }
  0x91   : > { %v296_v30 = vadd.s32 %v295_v26, %v294_v24  ;;  %v302_v31 = vrot.slane %v301_v27, 2  ;;  %p708_p1 = pneg %p707_p12  ;;  %p714_p11 = por %p713_p9, %p712_p2 }
  0x93   : > { %v297_v32 = vrot.slane %v296_v30, 1  ;;  %v303_v33 = vadd.s32 %v302_v31, %v301_v27  ;;  %p715_p3 = pnand %p714_p11, %p708_p1 }
  0x95   : > { %v298_v35 = vadd.s32 %v297_v32, %v296_v30  ;;  %v304_v36 = vrot.slane %v303_v33, 1 }
  0x97   : > { %v305_v37 = vadd.s32 %v304_v36, %v303_v33 }
  0x99   : > { %v306_v39 = vcombine.low %v298_v35, %v305_v37 }
  0x9b   : > { %v313_v40 = vrot.slane %v306_v39, %v312_v38 }
  0x9d   : > { %v320_v41 = vrot.slane %v313_v40, %v312_v38 }
  0x9f   : > { %325 = vst.msk [vmem:[%s262_s4] sm:$0x3] %vm323_vm2, %v320_v41 }
  0xa0   : > { %718 = shalt.err (!%p715_p3)
}
  0xa1   : > { %s719_s23 = scalar_lea.hbm %s1036_s28, 32  ;;  %s723_s9 = scalar_lea.hbm %s1086_s3, 64 }
  0xa2   : > { %p720_p6 = scmp.ne.s32.totalorder %s1036_s28, %s719_s23  ;;  %p724_p0 = scmp.lt.u32.totalorder %s1036_s28, %s1086_s3 }
  0xa3   : > { %p725_p7 = scmp.lt.u32.totalorder %s723_s9, %s719_s23  ;;  %p727_p10 = scmp.lt.u32.totalorder %s719_s23, %s1036_s28 }
  0xa4   : > { %p721_p13 = pnand %p720_p6, %p1099_p5 }
  0xa5   : > { %p726_p4 = por %p725_p7, %p724_p0 }
  0xa6   : > { %p722_p8 = pneg %p721_p13 }
  0xa7   : > { %p728_p12 = por %p727_p10, %p726_p4 }
  0xa9   : > { %p729_p1 = pnand %p728_p12, %p722_p8 }
  0xab   : > { %732 = shalt.err (!%p729_p1)
}
  0xac   : > { %542 = dma.vmem_to_hbm [thread:$0]  (%p1099_p5), %s1031_s6, 32, %s1036_s28, %s332_s19  }
  0xad PF: > { %s376_s5 = sand.u32 1, %s775_s12   ;;  %p1100_p2 = scmp.ne.s32.totalorder %s1092_s27, 0 }
  0xae   : > { %p1101_p9 = scmp.ge.s32.totalorder %s795_s17, 2  ;;  %s377_s4 = scalar_lea.sflag [#allocation4], %s376_s5 }
  0xb0   : > { %p553_p11 = pnand %p1101_p9, %p1100_p2 }
  0xb2   : > { %766 = dma.done.wait (!%p553_p11), %s377_s4, 64  }
  0xb3   : > { %768 = vsyncadd (!%p553_p11), %s377_s4, 4294967232  ;;  %s386_s30 = scalar_lea.sflag [#allocation9], %s376_s5 }
  0xb4   : > { %770 = dma.done.wait (!%p553_p11), %s386_s30, 32  }
  0xb5   : > { %772 = vsyncadd (!%p553_p11), %s386_s30, 4294967264  ;;  %s26_s17 = sadd.s32 1, %s795_s17   ;;  %s1102_s12 = smov %s779_s13 }
  0xb6   : > { %p23_p3 = scmp.ge.s32.totalorder %s26_s17, 4   ;;  %s1103_s13 = smov %s783_s14 }
  0xb7   : > { %s1104_s14 = smov %s880_s26  ;;  %s1105_s15 = smov %s791_s16 }
  0xb8   : > { %s1106_s16 = smov %s1108_s20  ;;  %25 = sbr.rel (!%p23_p3) target bundleno = 10 (0xa), region = 103 }
  0xbf   :  { %391 = vsyncpa [#allocation3], 1 }
  0xc0   :  { %393 = vsyncpa [#allocation3 + $0x1], 1 }
  0xc1   :  { %394 = vsyncpa [#allocation6], 1 }
  0xc2   :  { %396 = vsyncpa [#allocation6 + $0x1], 1 }
  0xc3   :  { %397 = vsyncpa [#allocation4], 1 }
  0xc4   :  { %399 = vsyncpa [#allocation4 + $0x1], 1 }
  0xc5   :  { %400 = vsyncpa [#allocation9], 1 }
  0xc6   :  { %402 = vsyncpa [#allocation9 + $0x1], 1 }

</bundles_post_ra>
